<compile_context>
chip_gen: v7x
topology: tpu7x:2x2x1
jax: 0.10.0
libtpu: 0.0.40
codegen_flags: <defaults>
</compile_context>

<pallas_src>
from functools import partial

import jax
import jax.numpy as jnp
from jax.experimental import pallas as pl
from jax.experimental.pallas import tpu as pltpu


def _round_up(x, m):
    return ((x + m - 1) // m) * m


def _choose_row_tile(H, Wp, cin_pad, max_block_bytes=2 * 1024 * 1024):
    """Largest row-tile dividing H with the bf16 input block <= max_block_bytes."""
    for th in (256, 128, 64, 32, 16, 8):
        if H % th == 0 and (th + 2) * Wp * cin_pad * 2 <= max_block_bytes:
            return th
    return H  # fallback: whole image per grid step (small images)


def _choose_cout_tile(cout_pad, TH, W, KH, KW, cin_pad,
                      max_block_bytes=4 * 1024 * 1024):
    """Largest 128-multiple dividing cout_pad with bounded acc/weight blocks."""
    best = 128
    t = 128
    while t <= cout_pad:
        if (cout_pad % t == 0
                and TH * W * t * 4 <= max_block_bytes            # f32 acc / out
                and KH * KW * cin_pad * t * 2 <= max_block_bytes):  # bf16 weights
            best = t
        t += 128
    return best


def conv_bn_relu_kernel(x_ref, w_ref, scale_ref, bias_ref, o_ref,
                        xcat_ref, acc_ref, *, TH, W, KH, KW, C):
    # x_ref:     (1, TH+2, W+2, C)     bf16 padded input rows (1-row halo/side)
    # w_ref:     (KH, KW*C, TCO)       bf16 weights, kw folded into contraction
    # scale_ref: (1, TCO)              f32 folded BN scale = gamma/sqrt(var+eps)
    # bias_ref:  (1, TCO)              f32 folded BN bias  = beta - mean*scale
    # o_ref:     (1, TH, W, TCO)
    # xcat_ref:  (TH+2, W, KW*C)       bf16 VMEM scratch: KW-folded lhs slab
    # acc_ref:   (TH*W, TCO)           f32 VMEM scratch accumulator
    co = pl.program_id(2)

    # Build the KW-folded slab once per (batch, row-tile).  The co axis is the
    # innermost grid axis (and "arbitrary"), so co == 0 always runs first and
    # the slab is reused for every output-channel tile.
    @pl.when(co == 0)
    def _():
        x = x_ref[0]                                      # (TH+2, W+2, C)
        for kw in range(KW):                              # lane-aligned stores
            xcat_ref[:, :, kw * C:(kw + 1) * C] = x[:, kw:kw + W, :]

    xc = xcat_ref[...]                                    # (TH+2, W, KW*C)

    # KH matmuls with contraction depth KW*C (bf16 x bf16 -> f32 on the MXU).
    acc_ref[...] = jnp.dot(xc[0:TH].reshape(TH * W, KW * C), w_ref[0],
                           preferred_element_type=jnp.float32)
    for kh in range(1, KH):
        acc_ref[...] += jnp.dot(xc[kh:kh + TH].reshape(TH * W, KW * C),
                                w_ref[kh],
                                preferred_element_type=jnp.float32)

    # Fused eval-mode BN + ReLU epilogue; lane-dense (TCO = 128k) store.
    y = jnp.maximum(acc_ref[...] * scale_ref[...] + bias_ref[...], 0.0)
    o_ref[0] = y.reshape(TH, W, -1).astype(o_ref.dtype)


def conv_bn_relu(x_nchw, weight_oihw, gamma, beta, running_mean, running_var,
                 *, eps=1e-5, stride=1, padding=1, dilation=1, groups=1,
                 row_tile=None, cout_tile=None, out_dtype=jnp.float32):
    """ConvBNReLU forward (ks=3, stride=1, pad=1, no conv bias, eval-mode BN)."""
    N, Cin, H, W = x_nchw.shape
    Cout, Cin_w, KH, KW = weight_oihw.shape
    # Supported configuration (BiSeNetV2 ConvBNReLU defaults).
    assert Cin == Cin_w, "grouped conv not supported"
    assert (KH, KW) == (3, 3), "only ks=3 supported"
    assert stride == 1 and padding == 1 and dilation == 1 and groups == 1, \
        "only stride=1, padding=1, dilation=1, groups=1 supported"

    pad = 1
    Hp, Wp = H + 2 * pad, W + 2 * pad
    cin_p = _round_up(Cin, 128)
    cout_p = _round_up(Cout, 128)

    # ---- glue (plain JAX): layout, padding, channel padding, BN folding ----
    x_nhwc = jnp.transpose(x_nchw, (0, 2, 3, 1)).astype(jnp.float32)
    x_pad = jnp.pad(x_nhwc, ((0, 0), (pad, pad), (pad, pad), (0, cin_p - Cin)))
    x_pad = x_pad.astype(jnp.bfloat16)                        # (N, Hp, Wp, cin_p)

    w = jnp.transpose(weight_oihw, (2, 3, 1, 0)).astype(jnp.float32)  # HWIO
    w = jnp.pad(w, ((0, 0), (0, 0), (0, cin_p - Cin), (0, cout_p - Cout)))
    w = w.reshape(KH, KW * cin_p, cout_p).astype(jnp.bfloat16)

    scale = (gamma / jnp.sqrt(running_var + eps)).astype(jnp.float32)  # (Cout,)
    bias = (beta.astype(jnp.float32) - running_mean * scale)           # (Cout,)
    scale = jnp.pad(scale, (0, cout_p - Cout)).reshape(1, cout_p)
    bias = jnp.pad(bias, (0, cout_p - Cout)).reshape(1, cout_p)

    # ---- row tiling with a 1-row halo on each side ----
    TH = row_tile if row_tile is not None else _choose_row_tile(H, Wp, cin_p)
    if H % TH != 0:
        TH = H
    nt = H // TH
    # Overlapping (TH+2)-row windows, flattened to a rank-4 array.
    x_tiles = jnp.stack(
        [x_pad[:, i * TH:i * TH + TH + 2] for i in range(nt)], axis=1)
    x_tiles = x_tiles.reshape(N * nt, TH + 2, Wp, cin_p)

    # ---- output-channel tiling ----
    TCO = (cout_tile if cout_tile is not None
           else _choose_cout_tile(cout_p, TH, W, KH, KW, cin_p))
    assert TCO % 128 == 0 and cout_p % TCO == 0, "cout_tile must be 128k dividing padded Cout"
    nco = cout_p // TCO

    kernel = partial(conv_bn_relu_kernel, TH=TH, W=W, KH=KH, KW=KW, C=cin_p)

    out_nhwc = pl.pallas_call(
        kernel,
        out_shape=jax.ShapeDtypeStruct((N, H, W, cout_p), out_dtype),
        grid_spec=pltpu.PrefetchScalarGridSpec(
            num_scalar_prefetch=0,
            grid=(N, nt, nco),
            in_specs=[
                pl.BlockSpec((1, TH + 2, Wp, cin_p),
                             lambda b, i, co: (b * nt + i, 0, 0, 0)),
                pl.BlockSpec((KH, KW * cin_p, TCO),
                             lambda b, i, co: (0, 0, co)),
                pl.BlockSpec((1, TCO), lambda b, i, co: (0, co)),
                pl.BlockSpec((1, TCO), lambda b, i, co: (0, co)),
            ],
            out_specs=pl.BlockSpec((1, TH, W, TCO),
                                   lambda b, i, co: (b, i, 0, co)),
            scratch_shapes=[
                pltpu.VMEM((TH + 2, W, KW * cin_p), jnp.bfloat16),
                pltpu.VMEM((TH * W, TCO), jnp.float32),
            ],
        ),
        compiler_params=pltpu.CompilerParams(
            dimension_semantics=("parallel", "parallel", "arbitrary"),
            vmem_limit_bytes=32 * 1024 * 1024),
    )(x_tiles, w, scale, bias)

    out_nhwc = out_nhwc[..., :Cout]                    # drop channel padding
    return jnp.transpose(out_nhwc, (0, 3, 1, 2))       # back to NCHW


def _reference(x_nchw, weight_oihw, gamma, beta, running_mean, running_var,
               eps=1e-5):
    y = jax.lax.conv_general_dilated(
        x_nchw.astype(jnp.float32), weight_oihw.astype(jnp.float32),
        window_strides=(1, 1), padding=((1, 1), (1, 1)),
        dimension_numbers=("NCHW", "OIHW", "NCHW"),
        precision=jax.lax.Precision.HIGHEST)
    scale = (gamma / jnp.sqrt(running_var + eps)).reshape(1, -1, 1, 1)
    bias = (beta - running_mean * gamma / jnp.sqrt(running_var + eps)
            ).reshape(1, -1, 1, 1)
    return jnp.maximum(y * scale + bias, 0.0)


def _run_case(key, N, Cin, H, W, Cout, **kwargs):
    k1, k2, k3, k4, k5, k6 = jax.random.split(key, 6)
    x = jax.random.normal(k1, (N, Cin, H, W), jnp.float32)
    weight = jax.random.normal(k2, (Cout, Cin, 3, 3), jnp.float32) * 0.1
    gamma = jax.random.uniform(k3, (Cout,), jnp.float32, 0.5, 1.5)
    beta = jax.random.normal(k4, (Cout,), jnp.float32) * 0.1
    running_mean = jax.random.normal(k5, (Cout,), jnp.float32) * 0.1
    running_var = jax.random.uniform(k6, (Cout,), jnp.float32, 0.5, 1.5)

    out = conv_bn_relu(x, weight, gamma, beta, running_mean, running_var,
                       **kwargs)
    out = jax.block_until_ready(out)
    ref = _reference(x, weight, gamma, beta, running_mean, running_var)
    assert out.shape == (N, Cout, H, W)
    err = float(jnp.max(jnp.abs(out - ref)))
    # bf16 MXU operands vs f32 reference -> loosened tolerance.
    assert err < 5e-2, f"mismatch vs reference conv: max abs err = {err}"


if __name__ == "__main__":
    key = jax.random.PRNGKey(0)
    k_a, k_b = jax.random.split(key)

    # Case 1: module-default small shapes; row_tile=8 exercises the
    # multi-row-tile (halo) path: grid = (2, 2, 1).
    _run_case(k_a, N=2, Cin=4, H=16, W=16, Cout=8, row_tile=8)

    # Case 2: exercises the output-channel tiling path (padded Cout = 256,
    # cout_tile=128 -> grid = (2, 2, 2), folded-slab reuse across co).
    _run_case(k_b, N=2, Cin=4, H=16, W=16, Cout=160, row_tile=8, cout_tile=128)

    print("KERNEL_OK")
</pallas_src>

<mosaic_0001>
module attributes {stable_mosaic.version = 11 : i64} {
  func.func @conv_bn_relu_kernel(%arg0: i32, %arg1: i32, %arg2: i32, %arg3: memref<1x10x18x128xbf16, #tpu.memory_space<vmem>>, %arg4: memref<3x384x128xbf16, #tpu.memory_space<vmem>>, %arg5: memref<1x128xf32, #tpu.memory_space<vmem>>, %arg6: memref<1x128xf32, #tpu.memory_space<vmem>>, %arg7: memref<1x8x16x128xf32, #tpu.memory_space<vmem>>, %arg8: memref<10x16x384xbf16, #tpu.memory_space<vmem>>, %arg9: memref<128x128xf32, #tpu.memory_space<vmem>>) attributes {dimension_semantics = [#tpu.dimension_semantics<parallel>, #tpu.dimension_semantics<parallel>, #tpu.dimension_semantics<arbitrary>], iteration_bounds = array<i64: 2, 2, 1>, scalar_prefetch = 0 : i64, scratch_operands = 2 : i64, tpu.core_type = #tpu.core_type<tc>, window_params = [{transform_indices = @transform_0, window_bounds = array<i64: 1, 10, 18, 128>}, {transform_indices = @transform_1, window_bounds = array<i64: 3, 384, 128>}, {transform_indices = @transform_2, window_bounds = array<i64: 1, 128>}, {transform_indices = @transform_3, window_bounds = array<i64: 1, 128>}, {transform_indices = @transform_4, window_bounds = array<i64: 1, 8, 16, 128>}]} {
    %c0_i32 = arith.constant 0 : i32
    %0 = arith.cmpi eq, %arg2, %c0_i32 : i32
    %1 = arith.extui %0 : i1 to i32
    %c0_i32_0 = arith.constant 0 : i32
    %2 = arith.cmpi ne, %1, %c0_i32_0 : i32
    scf.if %2 {
      %c0_33 = arith.constant 0 : index
      %c0_34 = arith.constant 0 : index
      %c0_35 = arith.constant 0 : index
      %c0_36 = arith.constant 0 : index
      %39 = vector.load %arg3[%c0_33, %c0_34, %c0_35, %c0_36] : memref<1x10x18x128xbf16, #tpu.memory_space<vmem>>, vector<1x10x18x128xbf16>
      %40 = vector.shape_cast %39 : vector<1x10x18x128xbf16> to vector<10x18x128xbf16>
      %41 = vector.extract_strided_slice %40 {offsets = [0, 0, 0], sizes = [10, 16, 128], strides = [1, 1, 1]} : vector<10x18x128xbf16> to vector<10x16x128xbf16>
      %c0_37 = arith.constant 0 : index
      %c0_38 = arith.constant 0 : index
      %c0_39 = arith.constant 0 : index
      %42 = vector.load %arg8[%c0_37, %c0_38, %c0_39] : memref<10x16x384xbf16, #tpu.memory_space<vmem>>, vector<10x16x128xbf16>
      tpu.vector_store %arg8[%c0_37, %c0_38, %c0_39], %41 {strides = array<i32>} : memref<10x16x384xbf16, #tpu.memory_space<vmem>>, vector<10x16x128xbf16>,
      %43 = vector.extract_strided_slice %40 {offsets = [0, 1, 0], sizes = [10, 16, 128], strides = [1, 1, 1]} : vector<10x18x128xbf16> to vector<10x16x128xbf16>
      %c0_40 = arith.constant 0 : index
      %c0_41 = arith.constant 0 : index
      %c128 = arith.constant 128 : index
      %44 = vector.load %arg8[%c0_40, %c0_41, %c128] : memref<10x16x384xbf16, #tpu.memory_space<vmem>>, vector<10x16x128xbf16>
      tpu.vector_store %arg8[%c0_40, %c0_41, %c128], %43 {strides = array<i32>} : memref<10x16x384xbf16, #tpu.memory_space<vmem>>, vector<10x16x128xbf16>,
      %45 = vector.extract_strided_slice %40 {offsets = [0, 2, 0], sizes = [10, 16, 128], strides = [1, 1, 1]} : vector<10x18x128xbf16> to vector<10x16x128xbf16>
      %c0_42 = arith.constant 0 : index
      %c0_43 = arith.constant 0 : index
      %c256 = arith.constant 256 : index
      %46 = vector.load %arg8[%c0_42, %c0_43, %c256] : memref<10x16x384xbf16, #tpu.memory_space<vmem>>, vector<10x16x128xbf16>
      tpu.vector_store %arg8[%c0_42, %c0_43, %c256], %45 {strides = array<i32>} : memref<10x16x384xbf16, #tpu.memory_space<vmem>>, vector<10x16x128xbf16>,
    } else {
    }
    %c0 = arith.constant 0 : index
    %c0_1 = arith.constant 0 : index
    %c0_2 = arith.constant 0 : index
    %3 = vector.load %arg8[%c0, %c0_1, %c0_2] : memref<10x16x384xbf16, #tpu.memory_space<vmem>>, vector<10x16x384xbf16>
    %4 = vector.extract_strided_slice %3 {offsets = [0, 0, 0], sizes = [8, 16, 384], strides = [1, 1, 1]} : vector<10x16x384xbf16> to vector<8x16x384xbf16>
    %5 = vector.shape_cast %4 : vector<8x16x384xbf16> to vector<128x384xbf16>
    %c0_3 = arith.constant 0 : index
    %c0_4 = arith.constant 0 : index
    %c0_5 = arith.constant 0 : index
    %6 = vector.load %arg4[%c0_3, %c0_4, %c0_5] : memref<3x384x128xbf16, #tpu.memory_space<vmem>>, vector<1x384x128xbf16>
    %7 = vector.shape_cast %6 : vector<1x384x128xbf16> to vector<384x128xbf16>
    %cst = arith.constant dense<0.000000e+00> : vector<128x128xf32>
    %8 = tpu.matmul %5, %7, %cst {dimension_numbers = #tpu.dot_dimension_numbers<[1], [0], [0], [1], [0, 0, 1, 1], [], []>} : vector<128x384xbf16>, vector<384x128xbf16>, vector<128x128xf32> -> vector<128x128xf32>
    %c0_6 = arith.constant 0 : index
    %c0_7 = arith.constant 0 : index
    %9 = vector.load %arg9[%c0_6, %c0_7] : memref<128x128xf32, #tpu.memory_space<vmem>>, vector<128x128xf32>
    tpu.vector_store %arg9[%c0_6, %c0_7], %8 {strides = array<i32>} : memref<128x128xf32, #tpu.memory_space<vmem>>, vector<128x128xf32>,
    %c0_8 = arith.constant 0 : index
    %c0_9 = arith.constant 0 : index
    %10 = vector.load %arg9[%c0_8, %c0_9] : memref<128x128xf32, #tpu.memory_space<vmem>>, vector<128x128xf32>
    %11 = vector.extract_strided_slice %3 {offsets = [1, 0, 0], sizes = [8, 16, 384], strides = [1, 1, 1]} : vector<10x16x384xbf16> to vector<8x16x384xbf16>
    %12 = vector.shape_cast %11 : vector<8x16x384xbf16> to vector<128x384xbf16>
    %c1 = arith.constant 1 : index
    %c0_10 = arith.constant 0 : index
    %c0_11 = arith.constant 0 : index
    %13 = vector.load %arg4[%c1, %c0_10, %c0_11] : memref<3x384x128xbf16, #tpu.memory_space<vmem>>, vector<1x384x128xbf16>
    %14 = vector.shape_cast %13 : vector<1x384x128xbf16> to vector<384x128xbf16>
    %cst_12 = arith.constant dense<0.000000e+00> : vector<128x128xf32>
    %15 = tpu.matmul %12, %14, %cst_12 {dimension_numbers = #tpu.dot_dimension_numbers<[1], [0], [0], [1], [0, 0, 1, 1], [], []>} : vector<128x384xbf16>, vector<384x128xbf16>, vector<128x128xf32> -> vector<128x128xf32>
    %16 = arith.addf %10, %15 : vector<128x128xf32>
    %c0_13 = arith.constant 0 : index
    %c0_14 = arith.constant 0 : index
    %17 = vector.load %arg9[%c0_13, %c0_14] : memref<128x128xf32, #tpu.memory_space<vmem>>, vector<128x128xf32>
    tpu.vector_store %arg9[%c0_13, %c0_14], %16 {strides = array<i32>} : memref<128x128xf32, #tpu.memory_space<vmem>>, vector<128x128xf32>,
    %c0_15 = arith.constant 0 : index
    %c0_16 = arith.constant 0 : index
    %18 = vector.load %arg9[%c0_15, %c0_16] : memref<128x128xf32, #tpu.memory_space<vmem>>, vector<128x128xf32>
    %19 = vector.extract_strided_slice %3 {offsets = [2, 0, 0], sizes = [8, 16, 384], strides = [1, 1, 1]} : vector<10x16x384xbf16> to vector<8x16x384xbf16>
    %20 = vector.shape_cast %19 : vector<8x16x384xbf16> to vector<128x384xbf16>
    %c2 = arith.constant 2 : index
    %c0_17 = arith.constant 0 : index
    %c0_18 = arith.constant 0 : index
    %21 = vector.load %arg4[%c2, %c0_17, %c0_18] : memref<3x384x128xbf16, #tpu.memory_space<vmem>>, vector<1x384x128xbf16>
    %22 = vector.shape_cast %21 : vector<1x384x128xbf16> to vector<384x128xbf16>
    %cst_19 = arith.constant dense<0.000000e+00> : vector<128x128xf32>
    %23 = tpu.matmul %20, %22, %cst_19 {dimension_numbers = #tpu.dot_dimension_numbers<[1], [0], [0], [1], [0, 0, 1, 1], [], []>} : vector<128x384xbf16>, vector<384x128xbf16>, vector<128x128xf32> -> vector<128x128xf32>
    %24 = arith.addf %18, %23 : vector<128x128xf32>
    %c0_20 = arith.constant 0 : index
    %c0_21 = arith.constant 0 : index
    %25 = vector.load %arg9[%c0_20, %c0_21] : memref<128x128xf32, #tpu.memory_space<vmem>>, vector<128x128xf32>
    tpu.vector_store %arg9[%c0_20, %c0_21], %24 {strides = array<i32>} : memref<128x128xf32, #tpu.memory_space<vmem>>, vector<128x128xf32>,
    %c0_22 = arith.constant 0 : index
    %c0_23 = arith.constant 0 : index
    %26 = vector.load %arg9[%c0_22, %c0_23] : memref<128x128xf32, #tpu.memory_space<vmem>>, vector<128x128xf32>
    %c0_24 = arith.constant 0 : index
    %c0_25 = arith.constant 0 : index
    %27 = vector.load %arg5[%c0_24, %c0_25] : memref<1x128xf32, #tpu.memory_space<vmem>>, vector<1x128xf32>
    %28 = vector.broadcast %27 : vector<1x128xf32> to vector<128x128xf32>
    %29 = arith.mulf %26, %28 : vector<128x128xf32>
    %c0_26 = arith.constant 0 : index
    %c0_27 = arith.constant 0 : index
    %30 = vector.load %arg6[%c0_26, %c0_27] : memref<1x128xf32, #tpu.memory_space<vmem>>, vector<1x128xf32>
    %31 = vector.broadcast %30 : vector<1x128xf32> to vector<128x128xf32>
    %32 = arith.addf %29, %31 : vector<128x128xf32>
    %cst_28 = arith.constant 0.000000e+00 : f32
    %33 = vector.broadcast %cst_28 : f32 to vector<128x128xf32>
    %34 = arith.maximumf %32, %33 : vector<128x128xf32>
    %35 = vector.shape_cast %34 : vector<128x128xf32> to vector<8x16x128xf32>
    %c0_29 = arith.constant 0 : index
    %c0_30 = arith.constant 0 : index
    %c0_31 = arith.constant 0 : index
    %c0_32 = arith.constant 0 : index
    %36 = vector.load %arg7[%c0_29, %c0_30, %c0_31, %c0_32] : memref<1x8x16x128xf32, #tpu.memory_space<vmem>>, vector<1x8x16x128xf32>
    %37 = vector.shape_cast %36 : vector<1x8x16x128xf32> to vector<8x16x128xf32>
    %38 = vector.shape_cast %35 : vector<8x16x128xf32> to vector<1x8x16x128xf32>
    tpu.vector_store %arg7[%c0_29, %c0_30, %c0_31, %c0_32], %38 {strides = array<i32>} : memref<1x8x16x128xf32, #tpu.memory_space<vmem>>, vector<1x8x16x128xf32>,
    return
  }
  func.func @transform_0(%arg0: i32, %arg1: i32, %arg2: i32) -> (i32, i32, i32, i32) {
    %c2_i32 = arith.constant 2 : i32
    %0 = arith.muli %arg0, %c2_i32 : i32
    %1 = arith.addi %0, %arg1 : i32
    %c0_i32 = arith.constant 0 : i32
    %c0_i32_0 = arith.constant 0 : i32
    %c0_i32_1 = arith.constant 0 : i32
    %c0_i32_2 = arith.constant 0 : i32
    return %1, %c0_i32, %c0_i32_0, %c0_i32_1 : i32, i32, i32, i32
  }
  func.func @transform_1(%arg0: i32, %arg1: i32, %arg2: i32) -> (i32, i32, i32) {
    %c0_i32 = arith.constant 0 : i32
    %c0_i32_0 = arith.constant 0 : i32
    %c0_i32_1 = arith.constant 0 : i32
    return %c0_i32, %c0_i32_0, %arg2 : i32, i32, i32
  }
  func.func @transform_2(%arg0: i32, %arg1: i32, %arg2: i32) -> (i32, i32) {
    %c0_i32 = arith.constant 0 : i32
    %c0_i32_0 = arith.constant 0 : i32
    return %c0_i32, %arg2 : i32, i32
  }
  func.func @transform_3(%arg0: i32, %arg1: i32, %arg2: i32) -> (i32, i32) {
    %c0_i32 = arith.constant 0 : i32
    %c0_i32_0 = arith.constant 0 : i32
    return %c0_i32, %arg2 : i32, i32
  }
  func.func @transform_4(%arg0: i32, %arg1: i32, %arg2: i32) -> (i32, i32, i32, i32) {
    %c0_i32 = arith.constant 0 : i32
    %c0_i32_0 = arith.constant 0 : i32
    return %arg0, %arg1, %c0_i32, %arg2 : i32, i32, i32, i32
  }
}

</mosaic_0001>

<bundles_post_ra>
// kernel: tpu_custom_call.1
= control target key start
LH: loop header
LB: loop body
LE: loop exit
PB: predicated region body
PF: predicated region fallthrough
CT: control target
= control target key end

     0   :  { %9 = vsyncpa [#allocation5], 0  ;;  %s3763_s0 = inlined_call_operand.vmem [shape: bf16[4,10,18,128], index: 0, kind: input, shape index: {}]   ;;  %s3764_s1 = inlined_call_operand.vmem [shape: bf16[3,384,128], index: 1, kind: input, shape index: {}]   ;;  %s3765_s2 = inlined_call_operand.vmem [shape: f32[1,128], index: 2, kind: input, shape index: {}]   ;;  %s3766_s3 = inlined_call_operand.vmem [shape: f32[1,128], index: 3, kind: input, shape index: {}]   ;;  %s3767_s4 = inlined_call_operand.hbm [shape: f32[2,16,16,128], index: 4, kind: output, shape index: {}]  }
   0x1   :  { %11 = vsyncpa [#allocation5 + $0x1], 0  ;;  %s3072_s15 = smov 0   ;;  %s3074_s16 = smov 0  }
   0x2   :  { %s3076_s17 = smov 0   ;;  %s3078_s18 = smov 0  }
   0x3   :  { %s3080_s19 = smov 0   ;;  %s3082_s20 = smov 0  }
   0x4   :  { %s3084_s21 = smov 0   ;;  %s3086_s22 = smov 0  }
   0x5 LB: > { %s2139_s23 = sadd.s32 4294967295, %s3042_s22   ;;  %s2140_s24 = sadd.s32 4294967294, %s3042_s22   ;;  %s3042_s22 = sphi %s3086_s22, %s17_s22   ;;  %s3038_s21 = sphi %s3084_s21, %s3776_s21   ;;  %s3034_s20 = sphi %s3082_s20, %s3775_s20   ;;  %s3030_s19 = sphi %s3080_s19, %s3774_s19   ;;  %s3026_s18 = sphi %s3078_s18, %s3773_s18   ;;  %s3022_s17 = sphi %s3076_s17, %s3772_s17   ;;  %s3018_s16 = sphi %s3074_s16, %s3771_s16   ;;  %s3014_s15 = sphi %s3072_s15, %s3770_s15  }
   0x6   : > { %s32_s25 = sadd.s32 1, %s3034_s20  ;;  %s36_s26 = sadd.s32 1, %s3038_s21 }
   0x7   : > { %p34_p0 = scmp.ge.s32.totalorder %s32_s25, 2  ;;  %p165_p1 = scmp.ne.s32.totalorder %s3022_s17, %s3018_s16 }
   0x8   : > { %p166_p2 = scmp.eq.s32.totalorder %s2139_s23, 3  ;;  %p171_p5 = scmp.ne.s32.totalorder %s3018_s16, %s3014_s15 }
   0x9   : > { %s3778_s25 = smov (%p34_p0, %s32_s25), 0  ;;  %s3780_s26 = smov (!%p34_p0, %s36_s26), %s3038_s21 }
   0xa   : > { %s149_s27 = ssub.s32 %s3034_s20, %s3778_s25  ;;  %p3123_p3 = por %p166_p2, %p165_p1 }
   0xb   : > { %p38_p4 = scmp.ge.s32.totalorder %s3780_s26, 2  ;;  %p172_p6 = scmp.eq.s32.totalorder %s2140_s24, 3 }
   0xc   : > { %p2148_p7 = scmp.ge.s32.totalorder %s3042_s22, 1  ;;  %p221_p9 = scmp.lt.s32.totalorder %s3042_s22, 5 }
   0xd   : > { %s3782_s26 = smov (%p38_p4, %s3780_s26), 0  ;;  %p3132_p8 = por %p172_p6, %p171_p5 }
   0xe   : > { %s148_s30 = ssub.s32 %s3038_s21, %s3782_s26  ;;  %s155_s5 = sadd.s32 1, %s3022_s17 }
   0xf   : > { %s150_s6 = sor.u32 %s149_s27, %s148_s30  ;;  %p222_p10 = pnand %p2148_p7, %p221_p9 }
  0x10   : > { %p153_p11 = scmp.eq.s32.totalorder %s150_s6, 0  ;;  %v2856_v0 = vld [vmem:[%s3764_s1 + $0x40] sm:$0xff] (!%p222_p10)   ;;  %v2859_v3 = vld [vmem:[%s3764_s1 + $0x48] sm:$0xff] (!%p222_p10)   ;;  %s2150_s30 = sshll.u32 (!%p222_p10), %s3030_s19, 1  ;;  %v2862_v6 = vld [vmem:[%s3764_s1 + $0x50] sm:$0xff] (!%p222_p10)   ;;  %vm555_vm0 = vcmask (!%p222_p10), 1046528  }
  0x11   : > { %225 = sbr.rel (%p222_p10) target bundleno = 426 (0x1aa), region = 36  ;;  %v2857_v1 = vld [vmem:[%s3764_s1 + $0x80] sm:$0xff] (!%p222_p10)   ;;  %2350 = vmatprep.subr.bf16.mxu0 (!%p222_p10), %v2856_v0  ;;  %v2860_v4 = vld [vmem:[%s3764_s1 + $0x88] sm:$0xff] (!%p222_p10)   ;;  %v2863_v7 = vld [vmem:[%s3764_s1 + $0x90] sm:$0xff] (!%p222_p10)   ;;  %s260_s12 = sadd.s32 (!%p222_p10), %s3026_s18, %s2150_s30  ;;  %vm414_vm1 = vsmask.f32 (!%p222_p10), 7424 }
  0x12   : > { %s3141_s7 = scalar_select %p153_p11, %s3022_s17, %s155_s5  }
  0x13   : > { %v2858_v2 = vld [vmem:[%s3764_s1] sm:$0xff] (!%p222_p10)   ;;  %2590 = vmatprep.subr.bf16.mxu1 (!%p222_p10), %v2857_v1  ;;  %v2861_v5 = vld [vmem:[%s3764_s1 + $0x8] sm:$0xff] (!%p222_p10)   ;;  %v2864_v8 = vld [vmem:[%s3764_s1 + $0x10] sm:$0xff] (!%p222_p10)   ;;  %p261_p12 = scmp.lt.s32.totalorder (!%p222_p10), %s260_s12, 3  ;;  %s2349_s5 = sshll.u32 (!%p222_p10), %s3026_s18, 4 }
  0x14   : > { %2351 = vmatpush3.bf16.msra.mxu0 (!%p222_p10), %v2858_v2  ;;  %2591 = vmatpush3.bf16.msra.mxu1 (!%p222_p10), %v2857_v1  ;;  %v2865_v9 = vld [vmem:[%s3764_s1 + $0x58] sm:$0xff] (!%p222_p10)   ;;  %v2868_v12 = vld [vmem:[%s3764_s1 + $0x60] sm:$0xff] (!%p222_p10)   ;;  %v2871_v15 = vld [vmem:[%s3764_s1 + $0x68] sm:$0xff] (!%p222_p10)   ;;  %s2345_s8 = sshll.u32 (!%p222_p10), %s3030_s19, 5  ;;  %s3044_s14 = smov (!%p222_p10), [#allocation4]  }
  0x15   : > { %2352 = vmatprep.subr.bf16.mxu0 (!%p222_p10), %v2859_v3  ;;  %2592 = vmatprep.subr.bf16.mxu1 (!%p222_p10), %v2860_v4  ;;  %v2866_v10 = vld [vmem:[%s3764_s1 + $0x98] sm:$0xff] (!%p222_p10)   ;;  %v2869_v13 = vld [vmem:[%s3764_s1 + $0xa0] sm:$0xff] (!%p222_p10)   ;;  %v2872_v16 = vld [vmem:[%s3764_s1 + $0xa8] sm:$0xff] (!%p222_p10)   ;;  %s3675_s18 = sadd.s32 (!%p222_p10), %s2349_s5, %s2345_s8  ;;  %s2952_s23 = sshll.u32 (!%p222_p10), %s3044_s14, 4  ;;  %s2953_s23 = int_to_ptr.vmem [resolvable:$false] %s2952_s23 }
  0x16   : > { %v2867_v11 = vld [vmem:[%s3764_s1 + $0x18] sm:$0xff] (!%p222_p10)   ;;  %v2870_v14 = vld [vmem:[%s3764_s1 + $0x20] sm:$0xff] (!%p222_p10)   ;;  %v2873_v17 = vld [vmem:[%s3764_s1 + $0x28] sm:$0xff] (!%p222_p10)   ;;  %s2346_s19 = sshll.u32 (!%p222_p10), %s3675_s18, 7 }
  0x17   : > { %v2874_v18 = vld [vmem:[%s3764_s1 + $0x70] sm:$0xff] (!%p222_p10)   ;;  %v2877_v21 = vld [vmem:[%s3764_s1 + $0x78] sm:$0xff] (!%p222_p10)   ;;  %v2884_v31 = vld [vmem:[%s3764_s1 + $0x100] sm:$0xff] (!%p222_p10)   ;;  %s3700_s10 = scalar_lea.hbm (!%p222_p10), %s3767_s4, %s2346_s19 }
  0x18   : > { %2353 = vmatpush3.bf16.msra.mxu0 %v2861_v5  ;;  %2593 = vmatpush3.bf16.msra.mxu1 %v2860_v4  ;;  %s3784_s12 = smov (!%p261_p12, %s260_s12), 3  ;;  %v2875_v19 = vld [vmem:[%s3764_s1 + $0xb0] sm:$0xff]   ;;  %v2878_v22 = vld [vmem:[%s3764_s1 + $0xb8] sm:$0xff]   ;;  %v2885_v37 = vld [vmem:[%s3764_s1 + $0x1c0] sm:$0xff]  }
  0x19   : > { %2354 = vmatprep.subr.bf16.mxu0 %v2862_v6  ;;  %2594 = vmatprep.subr.bf16.mxu1 %v2863_v7  ;;  %s2782_s6 = smul.u32 120, %s3784_s12  ;;  %v2876_v20 = vld [vmem:[%s3764_s1 + $0x30] sm:$0xff]   ;;  %v2879_v25 = vld [vmem:[%s3764_s1 + $0x38] sm:$0xff]   ;;  %v2886_v40 = vld [vmem:[%s3764_s1 + $0xc0] sm:$0xff]  }
  0x1a   : > { %v2887_v43 = vld [vmem:[%s3764_s1 + $0x180] sm:$0xff]   ;;  %v2888_v46 = vld [vmem:[%s3764_s1 + $0x108] sm:$0xff]   ;;  %v2894_v61 = vld [vmem:[%s3764_s1 + $0x110] sm:$0xff]  }
  0x1b   : > { %s3211_s27 = scalar_lea.vmem %s3763_s0, %s2782_s6  ;;  %v2889_v48 = vld [vmem:[%s3764_s1 + $0xc8] sm:$0xff]   ;;  %v2896_v1 = vld [vmem:[%s3764_s1 + $0xd0] sm:$0xff]   ;;  %v2898_v6 = vld [vmem:[%s3764_s1 + $0x118] sm:$0xff]  }
  0x1c   : > { %2355 = vmatpush3.bf16.msra.mxu0 %v2864_v8  ;;  %2595 = vmatpush3.bf16.msra.mxu1 %v2863_v7  ;;  %v2880_v23 = vld [vmem:[%s3211_s27] sm:$0xff]   ;;  %v2881_v24 = vld [vmem:[%s3211_s27 + $0x8] ss:$0 sps:$4 sm:$0x11]   ;;  %v3225_v30 = vld [vmem:[%s3211_s27 + $0xc] sm:$0xff]  }
  0x1d   : > { %2356 = vmatprep.subr.bf16.mxu0 %v2865_v9  ;;  %2596 = vmatprep.subr.bf16.mxu1 %v2866_v10  ;;  %v416_v26 = vshrl.u32 %v2880_v23, 16  ;;  %v418_v27 = vshll.u32 %v2880_v23, 16  ;;  %v423_v28 = vshll.u32 %v2881_v24, 16  ;;  %v556_v29 = vrot.slane %v2880_v23, 1  ;;  %v3256_v51 = vld [vmem:[%s3211_s27 + $0x18] sm:$0xff]   ;;  %v3261_v56 = vld [vmem:[%s3211_s27 + $0x24] sm:$0xff]  }
  0x1e   : > { %v557_v32 = vrot.slane %v2881_v24, 1  ;;  %v2883_v33 = vld [vmem:[%s3211_s27 + $0x14] ss:$0 sps:$4 sm:$0x11]   ;;  %v559_v36 = vrot.slane %v3225_v30, 1  ;;  %v428_v44 = vshrl.u32 %v3225_v30, 16 }
  0x1f   : > { %v420_v34 = vrot.slane %v418_v27, 1  ;;  %v425_v35 = vrot.slane %v423_v28, 1  ;;  %v560_v39 = vrot.slane %v2883_v33, 1  ;;  %v430_v47 = vshll.u32 %v3225_v30, 16  ;;  %v2895_v0 = vld [vmem:[%s3764_s1 + $0x1c8] sm:$0xff]   ;;  %v2899_v8 = vld [vmem:[%s3764_s1 + $0xd8] sm:$0xff]  }
  0x20   : > { %2357 = vmatpush3.bf16.msra.mxu0 %v2867_v11  ;;  %2597 = vmatpush3.bf16.msra.mxu1 %v2866_v10  ;;  %v558_v38 = vsel %vm555_vm0, %v556_v29, %v557_v32  ;;  %v435_v49 = vshll.u32 %v2883_v33, 16  ;;  %v2891_v53 = vld [vmem:[%s3211_s27 + $0x20] ss:$0 sps:$4 sm:$0x11]   ;;  %v562_v55 = vrot.slane %v3256_v51, 1  ;;  %v565_v60 = vrot.slane %v3261_v56, 1 }
  0x21   : > { %2358 = vmatprep.subr.bf16.mxu0 %v2868_v12  ;;  %2598 = vmatprep.subr.bf16.mxu1 %v2869_v13  ;;  %v421_v41 = vor.u32 %v420_v34, %v416_v26  ;;  %v3240_v42 = vsel %vm555_vm0, %v559_v36, %v560_v39  ;;  %v432_v50 = vrot.slane %v430_v47, 1  ;;  %v563_v57 = vrot.slane %v2891_v53, 1  ;;  %v2893_v58 = vld [vmem:[%s3211_s27 + $0x2c] ss:$0 sps:$4 sm:$0x11]   ;;  %v3299_v11 = vld [vmem:[%s3211_s27 + $0x30] sm:$0xff]  }
  0x22   : > { %2606 = vmatprep.mubr.bf16.mxu1 %v558_v38  ;;  %v437_v52 = vrot.slane %v435_v49, 1  ;;  %v566_v63 = vrot.slane %v2893_v58, 1  ;;  %v440_v2 = vshrl.u32 %v3256_v51, 16  ;;  %v2897_v4 = vld [vmem:[%s3764_s1 + $0x188] sm:$0xff]   ;;  %v442_v5 = vshll.u32 %v3256_v51, 16  ;;  %v2906_v24 = vld [vmem:[%s3764_s1 + $0xe0] sm:$0xff]  }
  0x23   : > { %v426_v45 = vsel %vm414_vm1, %v421_v41, %v425_v35  ;;  %v433_v54 = vor.u32 %v432_v50, %v428_v44  ;;  %v3273_v62 = vsel %vm555_vm0, %v562_v55, %v563_v57  ;;  %v447_v7 = vshll.u32 %v2891_v53, 16  ;;  %v2907_v26 = vld [vmem:[%s3764_s1 + $0x190] sm:$0xff]   ;;  %v2908_v28 = vld [vmem:[%s3764_s1 + $0x128] sm:$0xff]   ;;  %v3356_v41 = vld [vmem:[%s3211_s27 + $0x5c] ss:$0 sps:$4 sm:$0x11]  }
  0x24   : > { %2359 = vmatpush3.bf16.msra.mxu0 %v2870_v14  ;;  %2599 = vmatpush3.bf16.msra.mxu1 %v2869_v13  ;;  %v3284_v3 = vsel %vm555_vm0, %v565_v60, %v566_v63  ;;  %v444_v9 = vrot.slane %v442_v5, 1  ;;  %v3302_v13 = vld [vmem:[%s3211_s27 + $0x38] ss:$0 sps:$4 sm:$0x11]   ;;  %v3305_v14 = vld [vmem:[%s3211_s27 + $0x3c] sm:$0xff]   ;;  %v452_v27 = vshrl.u32 %v3261_v56, 16 }
  0x25   : > { %2360 = vmatprep.subr.bf16.mxu0 %v2871_v15  ;;  %2600 = vmatprep.subr.bf16.mxu1 %v2872_v16  ;;  %v3265_v59 = vsel %vm414_vm1, %v433_v54, %v437_v52  ;;  %v449_v10 = vrot.slane %v447_v7, 1  ;;  %v568_v15 = vrot.slane %v3299_v11, 1  ;;  %v454_v29 = vshll.u32 %v3261_v56, 16  ;;  %v3348_v34 = vld [vmem:[%s3211_s27 + $0x48] sm:$0xff]   ;;  %v3353_v39 = vld [vmem:[%s3211_s27 + $0x54] sm:$0xff]   ;;  %v2920_v63 = vld [vmem:[%s3764_s1 + $0x140] sm:$0xff]  }
  0x26   : > { %860 = vmatprep.mubr.bf16.mxu0 %v426_v45  ;;  %v445_v12 = vor.u32 %v444_v9, %v440_v2  ;;  %v459_v32 = vshll.u32 %v2893_v58, 16  ;;  %v2911_v36 = vld [vmem:[%s3211_s27 + $0x50] ss:$0 sps:$4 sm:$0x11]   ;;  %v574_v38 = vrot.slane %v3348_v34, 1  ;;  %v577_v44 = vrot.slane %v3353_v39, 1 }
  0x27   : > { %v456_v33 = vrot.slane %v454_v29, 1  ;;  %v2914_v45 = vld [vmem:[%s3764_s1 + $0x130] sm:$0xff]   ;;  %v578_v47 = vrot.slane %v3356_v41, 1  ;;  %v464_v50 = vshrl.u32 %v3299_v11, 16  ;;  %v2917_v53 = vld [vmem:[%s3764_s1 + $0x198] sm:$0xff]   ;;  %v466_v54 = vshll.u32 %v3299_v11, 16 }
  0x28   : > { %2361 = vmatpush3.bf16.msra.mxu0 %v2873_v17  ;;  %2601 = vmatpush3.bf16.msra.mxu1 %v2872_v16  ;;  %v2904_v16 = vld [vmem:[%s3764_s1 + $0x120] sm:$0xff]   ;;  %v3312_v17 = vsel %vm414_vm1, %v445_v12, %v449_v10  ;;  %v461_v35 = vrot.slane %v459_v32, 1  ;;  %v2916_v49 = vld [vmem:[%s3764_s1 + $0xf0] sm:$0xff]   ;;  %v2918_v55 = vld [vmem:[%s3764_s1 + $0x138] sm:$0xff]   ;;  %v471_v57 = vshll.u32 %v3302_v13, 16  ;;  %v478_v5 = vshll.u32 %v3305_v14, 16 }
  0x29   : > { %2362 = vmatprep.subr.bf16.mxu0 %v2874_v18  ;;  %2602 = vmatprep.subr.bf16.mxu1 %v2875_v19  ;;  %v569_v18 = vrot.slane %v3302_v13, 1  ;;  %v3380_v52 = vsel %vm555_vm0, %v577_v44, %v578_v47  ;;  %v2919_v58 = vld [vmem:[%s3764_s1 + $0xf8] sm:$0xff]   ;;  %v468_v60 = vrot.slane %v466_v54, 1  ;;  %v2922_v2 = vld [vmem:[%s3764_s1 + $0x1a0] sm:$0xff]   ;;  %v2923_v9 = vld [vmem:[%s3764_s1 + $0x148] sm:$0xff]   ;;  %v488_v13 = vshrl.u32 %v3348_v34, 16 }
  0x2a   : > { %v480_v7 = vrot.slane %v478_v5, 1  ;;  %v2924_v10 = vld [vmem:[%s3764_s1 + $0x1e8] sm:$0xff]   ;;  %v507_v32 = vshll.u32 %v3356_v41, 16  ;;  %v3463_v41 = vld [vmem:[%s3764_s1 + $0x200] sm:$0xff]   ;;  %v2936_v47 = vld [vmem:[%s3764_s1 + $0x170] sm:$0xff]  }
  0x2b   : > { %v2925_v12 = vld [vmem:[%s3764_s1 + $0x1a8] sm:$0xff]  }
  0x2c   : > { %2363 = vmatpush3.bf16.msra.mxu0 %v2876_v20  ;;  %2603 = vmatpush3.bf16.msra.mxu1 %v2875_v19  ;;  %v3316_v19 = vld [vmem:[%s3211_s27 + $0x44] ss:$0 sps:$4 sm:$0x11]   ;;  %v571_v20 = vrot.slane %v3305_v14, 1 }
  0x2d   : > { %2364 = vmatprep.subr.bf16.mxu0 %v2877_v21  ;;  %2604 = vmatprep.subr.bf16.mxu1 %v2878_v22  ;;  %v2905_v21 = vld [vmem:[%s3764_s1 + $0x1d0] sm:$0xff]  }
  0x30   : > { %2365 = vmatpush3.bf16.msra.mxu0 %v2879_v25  ;;  %2605 = vmatpush3.bf16.msra.mxu1 %v2878_v22  ;;  %v3324_v22 = vsel %vm555_vm0, %v568_v15, %v569_v18  ;;  %v490_v15 = vshll.u32 %v3348_v34, 16 }
  0x31   : > { %2430 = vmatprep.subr.bf16.mxu1 %v2884_v31  ;;  %2510 = vmatprep.subr.bf16.mxu0 %v2885_v37  ;;  %v2909_v31 = vld [vmem:[%s3764_s1 + $0xe8] sm:$0xff]   ;;  %v457_v37 = vor.u32 %v456_v33, %v452_v27  ;;  %v2928_v27 = vld [vmem:[%s3764_s1 + $0x1b0] sm:$0xff]   ;;  %v2929_v33 = vld [vmem:[%s3764_s1 + $0x158] sm:$0xff]  }
  0x33   : > { %861 = vmatmul.mubr.bf16.vlgmr.msra.gmra.mrb[0].mxu0 %v2880_v23  ;;  %2607 = vmatmul.mubr.bf16.vlgmr.msra.gmra.mrb[0].mxu1 %v3240_v42  ;;  %v572_v23 = vrot.slane %v3316_v19, 1 }
  0x34   : > { %2431 = vmatpush3.bf16.msra.mxu1 %v2886_v40  ;;  %2511 = vmatpush3.bf16.msra.mxu0 %v2887_v43  ;;  %v575_v40 = vrot.slane %v2911_v36, 1  ;;  %v3359_v43 = vsel %vm414_vm1, %v457_v37, %v461_v35  ;;  %v2930_v35 = vld [vmem:[%s3764_s1 + $0x1f8] sm:$0xff]   ;;  %v509_v37 = vrot.slane %v507_v32, 1 }
  0x35   : > { %2432 = vmatprep.subr.bf16.mxu1 %v2888_v46  ;;  %868 = vmatprep.mubr.bf16.mxu0 %v3265_v59  ;;  %v3333_v25 = vsel %vm555_vm0, %v571_v20, %v572_v23 }
  0x36   : > { %2610 = vmatprep.mubr.bf16.mxu1 %v3273_v62  ;;  %2512 = vmatprep.subr.bf16.mxu0 %v2895_v0  ;;  %v3367_v46 = vsel %vm555_vm0, %v574_v38, %v575_v40  ;;  %v469_v0 = vor.u32 %v468_v60, %v464_v50  ;;  %v2931_v38 = vld [vmem:[%s3764_s1 + $0x1b8] sm:$0xff]   ;;  %v2932_v40 = vld [vmem:[%s3764_s1 + $0x160] sm:$0xff]  }
  0x37   : > { %v3490_v50 = vld [vmem:[%s3211_s27 + $0x60] sm:$0xff]  }
  0x38   : > { %2433 = vmatpush3.bf16.msra.mxu1 %v2889_v48  ;;  %2513 = vmatpush3.bf16.msra.mxu0 %v2897_v4  ;;  %v2915_v48 = vld [vmem:[%s3764_s1 + $0x1d8] sm:$0xff]   ;;  %v476_v4 = vshrl.u32 %v3305_v14, 16  ;;  %v514_v54 = vshll.u32 %v3490_v50, 16 }
  0x39   : > { %2434 = vmatprep.subr.bf16.mxu1 %v2894_v61  ;;  %2514 = vmatprep.subr.bf16.mxu0 %v2905_v21  ;;  %v473_v61 = vrot.slane %v471_v57, 1  ;;  %v2927_v21 = vld [vmem:[%s3764_s1 + $0x1f0] sm:$0xff]  }
  0x3a   : > { %v481_v18 = vor.u32 %v480_v7, %v476_v4 }
  0x3b   : > { %869 = vmatmul.mubr.bf16.gmra.mrb[4].mxu0 %v3225_v30  ;;  %2611 = vmatmul.mubr.bf16.gmra.mrb[4].mxu1 %v3284_v3 }
  0x3c   : > { %2435 = vmatpush3.bf16.msra.mxu1 %v2896_v1  ;;  %876 = vmatprep.mubr.bf16.mxu0 %v3312_v17  ;;  %v2921_v1 = vld [vmem:[%s3764_s1 + $0x1e0] sm:$0xff]  }
  0x3d   : > { %2436 = vmatprep.subr.bf16.mxu1 %v2898_v6  ;;  %2614 = vmatprep.mubr.bf16.mxu1 %v3324_v22  ;;  %v483_v6 = vshll.u32 %v3316_v19, 16  ;;  %v492_v19 = vrot.slane %v490_v15, 1 }
  0x3e   : > { %2515 = vmatpush3.bf16.msra.mxu0 %v2907_v26 }
  0x3f   : > { %2516 = vmatprep.subr.bf16.mxu0 %v2915_v48  ;;  %v493_v26 = vor.u32 %v492_v19, %v488_v13  ;;  %v2940_v48 = vld [vmem:[%s3764_s1 + $0x178] sm:$0xff]  }
  0x40   : > { %2437 = vmatpush3.bf16.msra.mxu1 %v2899_v8  ;;  %v485_v8 = vrot.slane %v483_v6, 1 }
  0x41   : > { %2438 = vmatprep.subr.bf16.mxu1 %v2904_v16  ;;  %v495_v16 = vshll.u32 %v2911_v36, 16 }
  0x42   : > { %2517 = vmatpush3.bf16.msra.mxu0 %v2917_v53  ;;  %v3429_v23 = vsel %vm414_vm1, %v481_v18, %v485_v8  ;;  %v3502_v53 = vld [vmem:[%s3211_s27 + $0x68] ss:$0 sps:$4 sm:$0x11]  }
  0x43   : > { %877 = vmatmul.mubr.bf16.gmra.mrb[8].mxu0 %v3256_v51  ;;  %2615 = vmatmul.mubr.bf16.gmra.mrb[8].mxu1 %v3333_v25  ;;  %v497_v20 = vrot.slane %v495_v16, 1  ;;  %v519_v57 = vshll.u32 %v3502_v53, 16  ;;  %v581_v7 = vrot.slane %v3502_v53, 1 }
  0x44   : > { %2439 = vmatpush3.bf16.msra.mxu1 %v2906_v24  ;;  %884 = vmatprep.mubr.bf16.mxu0 %v3359_v43  ;;  %v502_v24 = vshll.u32 %v3353_v39, 16 }
  0x45   : > { %2440 = vmatprep.subr.bf16.mxu1 %v2908_v28  ;;  %2618 = vmatprep.mubr.bf16.mxu1 %v3367_v46  ;;  %v500_v28 = vshrl.u32 %v3353_v39, 16  ;;  %v3441_v29 = vsel %vm414_vm1, %v493_v26, %v497_v20  ;;  %v521_v60 = vrot.slane %v519_v57, 1 }
  0x46   : > { %2518 = vmatprep.subr.bf16.mxu0 %v2921_v1  ;;  %v2947_v1 = vld [vmem:[%s3764_s1 + $0x238] sm:$0xff]  }
  0x47   : > { %2519 = vmatpush3.bf16.msra.mxu0 %v2922_v2 }
  0x48   : > { %2441 = vmatpush3.bf16.msra.mxu1 %v2909_v31  ;;  %2520 = vmatprep.subr.bf16.mxu0 %v2924_v10  ;;  %v504_v31 = vrot.slane %v502_v24, 1 }
  0x49   : > { %2442 = vmatprep.subr.bf16.mxu1 %v2914_v45  ;;  %v2934_v45 = vld [vmem:[%s3764_s1 + $0x168] sm:$0xff]  }
  0x4a   : > { %v505_v36 = vor.u32 %v504_v31, %v500_v28 }
  0x4b   : > { %885 = vmatmul.mubr.bf16.gmra.mrb[12].mxu0 %v3261_v56  ;;  %2619 = vmatmul.mubr.bf16.gmra.mrb[12].mxu1 %v3380_v52 }
  0x4c   : > { %2443 = vmatpush3.bf16.msra.mxu1 %v2916_v49  ;;  %1279 = vmatprep.mubr.bf16.mxu1 %v3265_v59  ;;  %v3408_v59 = vsel %vm414_vm1, %v469_v0, %v473_v61  ;;  %v3466_v44 = vsel %vm414_vm1, %v505_v36, %v509_v37  ;;  %v2935_v49 = vld [vmem:[%s3764_s1 + $0x208] sm:$0xff]   ;;  %v2942_v61 = vld [vmem:[%s3764_s1 + $0x220] sm:$0xff]   ;;  %v2944_v0 = vld [vmem:[%s3764_s1 + $0x230] sm:$0xff]  }
  0x4d   : > { %2444 = vmatprep.subr.bf16.mxu1 %v2918_v55  ;;  %892 = vmatprep.mubr.bf16.mxu0 %v3408_v59  ;;  %v516_v55 = vrot.slane %v514_v54, 1 }
  0x4e   : > { %2521 = vmatpush3.bf16.msra.mxu0 %v2925_v12 }
  0x4f   : > { %2522 = vmatprep.subr.bf16.mxu0 %v2927_v21 }
  0x50   : > { %2445 = vmatpush3.bf16.msra.mxu1 %v2919_v58 }
  0x51   : > { %2622 = vmatprep.subr.bf16.mxu1 %v2920_v63 }
  0x52   : > { %2523 = vmatpush3.bf16.msra.mxu0 %v2928_v27 }
  0x53   : > { %893 = vmatmul.mubr.bf16.gmra.mrb[16].mxu0 %v3299_v11  ;;  %1280 = vmatmul.mubr.bf16.vlgmr.msra.gmra.mrb[16].mxu1 %v3225_v30  ;;  %v2926_v30 = vld [vmem:[%s3764_s1 + $0x150] sm:$0xff]  }
  0x54   : > { %2623 = vmatpush3.bf16.msra.mxu1 %v2920_v63  ;;  %1287 = vmatprep.mubr.bf16.mxu1 %v3312_v17 }
  0x55   : > { %2624 = vmatprep.subr.bf16.mxu1 %v2923_v9  ;;  %900 = vmatprep.mubr.bf16.mxu0 %v3429_v23 }
  0x56   : > { %2524 = vmatprep.subr.bf16.mxu0 %v2930_v35 }
  0x57   : > { %2525 = vmatpush3.bf16.msra.mxu0 %v2931_v38 }
  0x58   : > { %2625 = vmatpush3.bf16.msra.mxu1 %v2923_v9  ;;  %2654 = vmatprep.subr.bf16.mxu0 %v3463_v41 }
  0x59   : > { %2626 = vmatprep.subr.bf16.mxu1 %v2926_v30 }
  0x5b   : > { %901 = vmatmul.mubr.bf16.gmra.mrb[20].mxu0 %v3305_v14  ;;  %1288 = vmatmul.mubr.bf16.gmra.mrb[20].mxu1 %v3256_v51 }
  0x5c   : > { %908 = vmatprep.mubr.bf16.mxu0 %v3441_v29  ;;  %1295 = vmatprep.mubr.bf16.mxu1 %v3359_v43 }
  0x5d   : > { %2627 = vmatpush3.bf16.msra.mxu1 %v2926_v30 }
  0x5e   : > { %2628 = vmatprep.subr.bf16.mxu1 %v2929_v33 }
  0x61   : > { %2629 = vmatpush3.bf16.msra.mxu1 %v2929_v33 }
  0x62   : > { %2630 = vmatprep.subr.bf16.mxu1 %v2932_v40 }
  0x63   : > { %909 = vmatmul.mubr.bf16.gmra.mrb[24].mxu0 %v3348_v34  ;;  %1296 = vmatmul.mubr.bf16.gmra.mrb[24].mxu1 %v3261_v56 }
  0x64   : > { %916 = vmatprep.mubr.bf16.mxu0 %v3466_v44  ;;  %1303 = vmatprep.mubr.bf16.mxu1 %v3408_v59 }
  0x65   : > { %2631 = vmatpush3.bf16.msra.mxu1 %v2932_v40 }
  0x66   : > { %2632 = vmatprep.subr.bf16.mxu1 %v2934_v45 }
  0x69   : > { %2633 = vmatpush3.bf16.msra.mxu1 %v2934_v45 }
  0x6a   : > { %2634 = vmatprep.subr.bf16.mxu1 %v2936_v47 }
  0x6b   : > { %917 = vmatmul.mubr.bf16.gmra.mrb[28].mxu0 %v3353_v39  ;;  %1304 = vmatmul.mubr.bf16.gmra.mrb[28].mxu1 %v3299_v11 }
  0x6c   : > { %1714 = vmatprep.mubr.bf16.mxu0 %v3312_v17  ;;  %1311 = vmatprep.mubr.bf16.mxu1 %v3429_v23  ;;  %v2937_v17 = vld [vmem:[%s3764_s1 + $0x210] sm:$0xff]  }
  0x6d   : > { %2635 = vmatpush3.bf16.msra.mxu1 %v2936_v47 }
  0x6e   : > { %2636 = vmatprep.subr.bf16.mxu1 %v2940_v48 }
  0x71   : > { %2637 = vmatpush3.bf16.msra.mxu1 %v2940_v48 }
  0x72   : > { %2686 = vmatprep.subr.bf16.mxu1 %v3463_v41 }
  0x73   : > { %1715 = vmatmul.mubr.bf16.vlgmr.msra.gmra.mrb[32].mxu0 %v3256_v51  ;;  %1312 = vmatmul.mubr.bf16.gmra.mrb[32].mxu1 %v3305_v14  ;;  %v512_v51 = vshrl.u32 %v3490_v50, 16 }
  0x74   : > { %2655 = vmatpush3.bf16.msra.mxu0 %v3463_v41  ;;  %1319 = vmatprep.mubr.bf16.mxu1 %v3441_v29 }
  0x75   : > { %1722 = vmatprep.mubr.bf16.mxu0 %v3359_v43  ;;  %2656 = vmatprep.subr.bf16.mxu0 %v2935_v49  ;;  %v2941_v43 = vld [vmem:[%s3764_s1 + $0x218] sm:$0xff]   ;;  %v517_v58 = vor.u32 %v516_v55, %v512_v51 }
  0x77   : > { %v522_v63 = vsel %vm414_vm1, %v517_v58, %v521_v60 }
  0x78   : > { %2657 = vmatpush3.bf16.msra.mxu0 %v2935_v49 }
  0x79   : > { %2658 = vmatprep.subr.bf16.mxu0 %v2937_v17 }
  0x7b   : > { %1723 = vmatmul.mubr.bf16.gmra.mrb[36].mxu0 %v3261_v56  ;;  %1320 = vmatmul.mubr.bf16.gmra.mrb[36].mxu1 %v3348_v34  ;;  %v2943_v56 = vld [vmem:[%s3764_s1 + $0x228] sm:$0xff]  }
  0x7c   : > { %1730 = vmatprep.mubr.bf16.mxu0 %v3408_v59  ;;  %1327 = vmatprep.mubr.bf16.mxu1 %v3466_v44 }
  0x7d   : > { %2659 = vmatpush3.bf16.msra.mxu0 %v2937_v17 }
  0x7e   : > { %2660 = vmatprep.subr.bf16.mxu0 %v2941_v43 }
  0x81   : > { %2661 = vmatpush3.bf16.msra.mxu0 %v2941_v43 }
  0x82   : > { %2662 = vmatprep.subr.bf16.mxu0 %v2942_v61 }
  0x83   : > { %1731 = vmatmul.mubr.bf16.gmra.mrb[40].mxu0 %v3299_v11  ;;  %1328 = vmatmul.mubr.bf16.gmra.mrb[40].mxu1 %v3353_v39  ;;  %v2945_v11 = vld [vmem:[%s3211_s27 + $0x6c] sm:$0xff]  }
  0x84   : > { %1738 = vmatprep.mubr.bf16.mxu0 %v3429_v23  ;;  %1335 = vmatprep.mubr.bf16.mxu1 %v522_v63  ;;  %v526_v2 = vshll.u32 %v2945_v11, 16  ;;  %v524_v4 = vshrl.u32 %v2945_v11, 16  ;;  %v583_v9 = vrot.slane %v2945_v11, 1 }
  0x85   : > { %2663 = vmatpush3.bf16.msra.mxu0 %v2942_v61 }
  0x86   : > { %2664 = vmatprep.subr.bf16.mxu0 %v2943_v56 }
  0x89   : > { %2665 = vmatpush3.bf16.msra.mxu0 %v2943_v56 }
  0x8a   : > { %2666 = vmatprep.subr.bf16.mxu0 %v2944_v0 }
  0x8b   : > { %1739 = vmatmul.mubr.bf16.gmra.mrb[44].mxu0 %v3305_v14  ;;  %1336 = vmatmul.mubr.bf16.gmra.mrb[44].mxu1 %v3490_v50  ;;  %v2946_v14 = vld [vmem:[%s3211_s27 + $0x74] ss:$0 sps:$4 sm:$0x11]   ;;  %s256_s27 = sand.u32 1, %s3018_s16  }
  0x8c   : > { %1746 = vmatprep.mubr.bf16.mxu0 %v3441_v29  ;;  %2638 = vmatprep.mubr.bf16.mxu1 %v3240_v42  ;;  %v528_v42 = vrot.slane %v526_v2, 1  ;;  %v531_v5 = vshll.u32 %v2946_v14, 16  ;;  %v584_v10 = vrot.slane %v2946_v14, 1  ;;  %s2149_s12 = sshll.u32 %s256_s27, 7  ;;  %s3711_s11 = scalar_lea.sflag [#allocation5], %s256_s27 }
  0x8d   : > { %2667 = vmatpush3.bf16.msra.mxu0 %v2944_v0  ;;  %s3654_s24 = scalar_lea.vmem [#allocation4], %s2149_s12  ;;  %s2954_s12 = scalar_lea.vmem %s2953_s23, 4096 }
  0x8e   : > { %2668 = vmatprep.subr.bf16.mxu0 %v2947_v1  ;;  %v533_v6 = vrot.slane %v531_v5, 1  ;;  %v585_v12 = vsel %vm555_vm0, %v583_v9, %v584_v10  ;;  %s2020_s30 = sshll.u32 %s3654_s24, 4  ;;  %s3702_s30 = int_to_ptr.vmem [resolvable:$true] %s2020_s30 }
  0x8f   : > { %s2948_s13 = scalar_lea.vmem %s3702_s30, 2048  ;;  %p2955_p2 = scmp.lt.s32.totalorder %s3702_s30, %s2953_s23 }
  0x90   : > { %p2949_p13 = scmp.ne.s32.totalorder %s3702_s30, %s2948_s13  ;;  %p2956_p4 = scmp.lt.s32.totalorder %s2954_s12, %s2948_s13 }
  0x91   : > { %2669 = vmatpush3.bf16.msra.mxu0 %v2947_v1 }
  0x92   : > { %p2950_p0 = pnand %p2949_p13, %p3123_p3  ;;  %p2957_p5 = por %p2956_p4, %p2955_p2 }
  0x93   : > { %1747 = vmatmul.mubr.bf16.gmra.mrb[48].mxu0 %v3348_v34  ;;  %2639 = vmatmul.mubr.bf16.vlgmr.msra.gmra.mrb[0].mxu1 %v3273_v62  ;;  %v529_v34 = vor.u32 %v528_v42, %v524_v4 }
  0x94   : > { %1754 = vmatprep.mubr.bf16.mxu0 %v3466_v44  ;;  %2694 = vmatpush3.bf16.msra.mxu1 %v3463_v41  ;;  %p2951_p1 = pneg %p2950_p0 }
  0x95   : > { %2642 = vmatprep.mubr.bf16.mxu1 %v3284_v3  ;;  %2687 = vmatprep.subr.bf16.mxu1 %v2935_v49  ;;  %v534_v59 = vsel %vm414_vm1, %v529_v34, %v533_v6 }
  0x96   : > { %p2958_p6 = pnand %p2957_p5, %p2951_p1 }
  0x98   : > { %2695 = vmatpush3.bf16.msra.mxu1 %v2935_v49 }
  0x99   : > { %2688 = vmatprep.subr.bf16.mxu1 %v2937_v17 }
  0x9b   : > { %1755 = vmatmul.mubr.bf16.gmra.mrb[52].mxu0 %v3353_v39  ;;  %2643 = vmatmul.mubr.bf16.gmra.mrb[4].mxu1 %v3324_v22  ;;  %v580_v39 = vrot.slane %v3490_v50, 1 }
  0x9c   : > { %1762 = vmatprep.mubr.bf16.mxu0 %v522_v63  ;;  %2696 = vmatpush3.bf16.msra.mxu1 %v2937_v17 }
  0x9d   : > { %2646 = vmatprep.mubr.bf16.mxu1 %v3333_v25  ;;  %2689 = vmatprep.subr.bf16.mxu1 %v2941_v43  ;;  %v582_v8 = vsel %vm555_vm0, %v580_v39, %v581_v7 }
  0xa0   : > { %2697 = vmatpush3.bf16.msra.mxu1 %v2941_v43 }
  0xa1   : > { %2690 = vmatprep.subr.bf16.mxu1 %v2942_v61 }
  0xa3   : > { %1763 = vmatmul.mubr.bf16.gmra.mrb[56].mxu0 %v3490_v50  ;;  %2647 = vmatmul.mubr.bf16.gmra.mrb[8].mxu1 %v3367_v46 }
  0xa4   : > { %1770 = vmatprep.mubr.bf16.mxu0 %v534_v59  ;;  %2698 = vmatpush3.bf16.msra.mxu1 %v2942_v61 }
  0xa5   : > { %2650 = vmatprep.mubr.bf16.mxu1 %v3380_v52  ;;  %2691 = vmatprep.subr.bf16.mxu1 %v2943_v56 }
  0xa8   : > { %2699 = vmatpush3.bf16.msra.mxu1 %v2943_v56 }
  0xa9   : > { %2692 = vmatprep.subr.bf16.mxu1 %v2944_v0 }
  0xab   : > { %1771 = vmatmul.mubr.bf16.gmra.mrb[60].mxu0 %v2945_v11  ;;  %2651 = vmatmul.mubr.bf16.gmra.mrb[12].mxu1 %v582_v8 }
  0xac   : > { %2670 = vmatprep.mubr.bf16.mxu0 %v3273_v62  ;;  %2700 = vmatpush3.bf16.msra.mxu1 %v2944_v0 }
  0xad   : > { %2678 = vmatprep.mubr.bf16.mxu1 %v3367_v46  ;;  %2693 = vmatprep.subr.bf16.mxu1 %v2947_v1 }
  0xb0   : > { %2701 = vmatpush3.bf16.msra.mxu1 %v2947_v1 }
  0xb3   : > { %2671 = vmatmul.mubr.bf16.vlgmr.msra.gmra.mrb[64].mxu0 %v3284_v3  ;;  %2679 = vmatmul.mubr.bf16.vlgmr.msra.gmra.mrb[8].mxu1 %v3380_v52 }
  0xb4   : > { %2674 = vmatprep.mubr.bf16.mxu0 %v3324_v22  ;;  %2682 = vmatprep.mubr.bf16.mxu1 %v582_v8 }
  0xbb   : > { %2675 = vmatmul.mubr.bf16.gmra.mrb[68].mxu0 %v3333_v25  ;;  %2683 = vmatmul.mubr.bf16.gmra.mrb[12].mxu1 %v585_v12 }
 0x106   : > { %v2366_v62 = vpop.f32.mrb[0].mxu0 }
 0x107   : > { %v2367_v13 = vpop.f32.mrb[1].mxu0 }
 0x108   : > { %v2368_v15 = vadd.f32 %v2367_v13, %v2366_v62  ;;  %v2369_v46 = vpop.f32.mrb[2].mxu0 }
 0x109   : > { %v2370_v16 = vpop.f32.mrb[3].mxu0 }
 0x10a   : > { %v2371_v18 = vadd.f32 %v2370_v16, %v2369_v46 }
 0x10e   : > { %v2372_v19 = vpop.f32.mrb[4].mxu0 }
 0x10f   : > { %v2373_v3 = vpop.f32.mrb[5].mxu0 }
 0x110   : > { %v2374_v20 = vadd.f32 %v2373_v3, %v2372_v19  ;;  %v2375_v52 = vpop.f32.mrb[6].mxu0 }
 0x111   : > { %v2376_v21 = vpop.f32.mrb[7].mxu0 }
 0x112   : > { %v2377_v22 = vadd.f32 %v2376_v21, %v2375_v52 }
 0x116   : > { %v2378_v23 = vpop.f32.mrb[8].mxu0 }
 0x117   : > { %v2379_v30 = vpop.f32.mrb[9].mxu0 }
 0x118   : > { %v2380_v24 = vadd.f32 %v2379_v30, %v2378_v23  ;;  %v2381_v26 = vpop.f32.mrb[10].mxu0 }
 0x119   : > { %v2382_v27 = vpop.f32.mrb[11].mxu0 }
 0x11a   : > { %v2383_v28 = vadd.f32 %v2382_v27, %v2381_v26 }
 0x11e   : > { %v2384_v25 = vpop.f32.mrb[12].mxu0 }
 0x11f   : > { %v2385_v29 = vpop.f32.mrb[13].mxu0 }
 0x120   : > { %v2386_v31 = vadd.f32 %v2385_v29, %v2384_v25  ;;  %v2387_v32 = vpop.f32.mrb[14].mxu0 }
 0x121   : > { %v2388_v33 = vpop.f32.mrb[15].mxu0 }
 0x122   : > { %v2389_v35 = vadd.f32 %v2388_v33, %v2387_v32 }
 0x126   : > { %v2390_v36 = vpop.f32.mrb[16].mxu0  ;;  %v2446_v37 = vpop.f32.mrb[16].mxu1 }
 0x127   : > { %v2391_v38 = vpop.f32.mrb[17].mxu0  ;;  %v2447_v41 = vpop.f32.mrb[17].mxu1 }
 0x128   : > { %v3558_v40 = vadd.f32 %v2391_v38, %v2390_v36  ;;  %v2393_v44 = vpop.f32.mrb[18].mxu0  ;;  %v2448_v45 = vadd.f32 %v2447_v41, %v2446_v37  ;;  %v2449_v47 = vpop.f32.mrb[18].mxu1 }
 0x129   : > { %v2394_v48 = vpop.f32.mrb[19].mxu0  ;;  %v2450_v50 = vpop.f32.mrb[19].mxu1 }
 0x12a   : > { %v2395_v49 = vadd.f32 %v2394_v48, %v2393_v44  ;;  %v2451_v17 = vadd.f32 %v2450_v50, %v2449_v47  ;;  %v3560_v53 = vadd.f32 %v2448_v45, %v2368_v15 }
 0x12c   : > { %v3562_v54 = vadd.f32 %v2451_v17, %v2371_v18 }
 0x12e   : > { %v2396_v51 = vpop.f32.mrb[20].mxu0  ;;  %v2452_v55 = vpop.f32.mrb[20].mxu1 }
 0x12f   : > { %v2397_v57 = vpop.f32.mrb[21].mxu0  ;;  %v2453_v58 = vpop.f32.mrb[21].mxu1 }
 0x130   : > { %v3564_v43 = vadd.f32 %v2397_v57, %v2396_v51  ;;  %v2399_v60 = vpop.f32.mrb[22].mxu0  ;;  %v2454_v61 = vadd.f32 %v2453_v58, %v2452_v55  ;;  %v2455_v63 = vpop.f32.mrb[22].mxu1 }
 0x131   : > { %v2400_v56 = vpop.f32.mrb[23].mxu0  ;;  %v2456_v1 = vpop.f32.mrb[23].mxu1 }
 0x132   : > { %v2401_v0 = vadd.f32 %v2400_v56, %v2399_v60  ;;  %v2457_v11 = vadd.f32 %v2456_v1, %v2455_v63  ;;  %v3566_v14 = vadd.f32 %v2454_v61, %v2374_v20 }
 0x134   : > { %v3568_v2 = vadd.f32 %v2457_v11, %v2377_v22 }
 0x136   : > { %v2402_v4 = vpop.f32.mrb[24].mxu0  ;;  %v2458_v42 = vpop.f32.mrb[24].mxu1 }
 0x137   : > { %v2403_v5 = vpop.f32.mrb[25].mxu0  ;;  %v2459_v6 = vpop.f32.mrb[25].mxu1 }
 0x138   : > { %v3570_v34 = vadd.f32 %v2403_v5, %v2402_v4  ;;  %v2405_v59 = vpop.f32.mrb[26].mxu0  ;;  %v2460_v39 = vadd.f32 %v2459_v6, %v2458_v42  ;;  %v2461_v7 = vpop.f32.mrb[26].mxu1 }
 0x139   : > { %v2406_v8 = vpop.f32.mrb[27].mxu0  ;;  %v2462_v10 = vpop.f32.mrb[27].mxu1 }
 0x13a   : > { %v2407_v9 = vadd.f32 %v2406_v8, %v2405_v59  ;;  %v2463_v12 = vadd.f32 %v2462_v10, %v2461_v7  ;;  %v3572_v62 = vadd.f32 %v2460_v39, %v2380_v24 }
 0x13c   : > { %v3574_v13 = vadd.f32 %v2463_v12, %v2383_v28 }
 0x13e   : > { %v2408_v15 = vpop.f32.mrb[28].mxu0  ;;  %v2464_v46 = vpop.f32.mrb[28].mxu1 }
 0x13f   : > { %v2409_v16 = vpop.f32.mrb[29].mxu0  ;;  %v2465_v19 = vpop.f32.mrb[29].mxu1 }
 0x140   : > { %v3576_v18 = vadd.f32 %v2409_v16, %v2408_v15  ;;  %v2411_v3 = vpop.f32.mrb[30].mxu0  ;;  %v2466_v20 = vadd.f32 %v2465_v19, %v2464_v46  ;;  %v2467_v52 = vpop.f32.mrb[30].mxu1 }
 0x141   : > { %v2412_v21 = vpop.f32.mrb[31].mxu0  ;;  %v2468_v23 = vpop.f32.mrb[31].mxu1 }
 0x142   : > { %v2413_v22 = vadd.f32 %v2412_v21, %v2411_v3  ;;  %v2469_v30 = vadd.f32 %v2468_v23, %v2467_v52  ;;  %v3578_v26 = vadd.f32 %v2466_v20, %v2386_v31 }
 0x144   : > { %v3580_v27 = vadd.f32 %v2469_v30, %v2389_v35 }
 0x146   : > { %v2526_v24 = vpop.f32.mrb[32].mxu0  ;;  %v2470_v28 = vpop.f32.mrb[32].mxu1 }
 0x147   : > { %v2527_v25 = vpop.f32.mrb[33].mxu0  ;;  %v2471_v29 = vpop.f32.mrb[33].mxu1 }
 0x148   : > { %v3582_v32 = vadd.f32 %v2527_v25, %v2526_v24  ;;  %v2529_v33 = vpop.f32.mrb[34].mxu0  ;;  %v2472_v36 = vadd.f32 %v2471_v29, %v2470_v28  ;;  %v2473_v37 = vpop.f32.mrb[34].mxu1 }
 0x149   : > { %v2530_v38 = vpop.f32.mrb[35].mxu0  ;;  %v2474_v41 = vpop.f32.mrb[35].mxu1 }
 0x14a   : > { %v3584_v44 = vadd.f32 %v2530_v38, %v2529_v33  ;;  %v2737_v45 = vadd.f32 %v2472_v36, %v3558_v40  ;;  %v2475_v47 = vadd.f32 %v2474_v41, %v2473_v37 }
 0x14c   : > { %v2743_v31 = vadd.f32 %v2475_v47, %v2395_v49 }
 0x14e   : > { %v2532_v48 = vpop.f32.mrb[36].mxu0  ;;  %v2476_v35 = vpop.f32.mrb[36].mxu1 }
 0x14f   : > { %v2533_v50 = vpop.f32.mrb[37].mxu0  ;;  %v2477_v17 = vpop.f32.mrb[37].mxu1 }
 0x150   : > { %v2534_v51 = vadd.f32 %v2533_v50, %v2532_v48  ;;  %v2535_v55 = vpop.f32.mrb[38].mxu0  ;;  %v2478_v57 = vadd.f32 %v2477_v17, %v2476_v35  ;;  %v2479_v58 = vpop.f32.mrb[38].mxu1 }
 0x151   : > { %v2536_v60 = vpop.f32.mrb[39].mxu0  ;;  %v2480_v61 = vpop.f32.mrb[39].mxu1 }
 0x152   : > { %v2537_v63 = vadd.f32 %v2536_v60, %v2535_v55  ;;  %v3588_v56 = vadd.f32 %v2478_v57, %v3564_v43  ;;  %v2481_v1 = vadd.f32 %v2480_v61, %v2479_v58 }
 0x154   : > { %v3590_v11 = vadd.f32 %v2481_v1, %v2401_v0 }
 0x156   : > { %v2538_v40 = vpop.f32.mrb[40].mxu0  ;;  %v2482_v4 = vpop.f32.mrb[40].mxu1 }
 0x157   : > { %v2539_v49 = vpop.f32.mrb[41].mxu0  ;;  %v2483_v42 = vpop.f32.mrb[41].mxu1 }
 0x158   : > { %v2540_v5 = vadd.f32 %v2539_v49, %v2538_v40  ;;  %v2541_v6 = vpop.f32.mrb[42].mxu0  ;;  %v2484_v59 = vadd.f32 %v2483_v42, %v2482_v4  ;;  %v2485_v39 = vpop.f32.mrb[42].mxu1 }
 0x159   : > { %v2542_v7 = vpop.f32.mrb[43].mxu0  ;;  %v2486_v8 = vpop.f32.mrb[43].mxu1 }
 0x15a   : > { %v2543_v10 = vadd.f32 %v2542_v7, %v2541_v6  ;;  %v3593_v12 = vadd.f32 %v2484_v59, %v3570_v34  ;;  %v2487_v15 = vadd.f32 %v2486_v8, %v2485_v39 }
 0x15c   : > { %v2755_v43 = vadd.f32 %v2487_v15, %v2407_v9 }
 0x15e   : > { %v2544_v46 = vpop.f32.mrb[44].mxu0  ;;  %v2488_v16 = vpop.f32.mrb[44].mxu1 }
 0x15f   : > { %v2545_v0 = vpop.f32.mrb[45].mxu0  ;;  %v2489_v19 = vpop.f32.mrb[45].mxu1 }
 0x160   : > { %v2546_v3 = vadd.f32 %v2545_v0, %v2544_v46  ;;  %v2547_v20 = vpop.f32.mrb[46].mxu0  ;;  %v2490_v52 = vadd.f32 %v2489_v19, %v2488_v16  ;;  %v2491_v21 = vpop.f32.mrb[46].mxu1 }
 0x161   : > { %v2548_v23 = vpop.f32.mrb[47].mxu0  ;;  %v2492_v30 = vpop.f32.mrb[47].mxu1 }
 0x162   : > { %v2549_v24 = vadd.f32 %v2548_v23, %v2547_v20  ;;  %v2746_v28 = vadd.f32 %v2490_v52, %v3576_v18  ;;  %v2493_v25 = vadd.f32 %v2492_v30, %v2491_v21  ;;  %v3629_v30 = vld [vmem:[%s3765_s2] ss:$0 sm:$0xff] }
 0x164   : > { %v2752_v29 = vadd.f32 %v2493_v25, %v2413_v22  ;;  %v3634_v25 = vld [vmem:[%s3766_s3] ss:$0 sm:$0xff] }
 0x166   : > { %v2550_v33 = vpop.f32.mrb[48].mxu0  ;;  %v2640_v34 = vpop.f32.mrb[0].mxu1 }
 0x167   : > { %v2551_v36 = vpop.f32.mrb[49].mxu0  ;;  %v2703_v9 = vadd.f32 %v3566_v14, %v2640_v34  ;;  %v1378_v37 = vpop.f32.mrb[1].mxu1 }
 0x168   : > { %v2552_v38 = vadd.f32 %v2551_v36, %v2550_v33  ;;  %v2553_v41 = vpop.f32.mrb[50].mxu0  ;;  %v2707_v47 = vadd.f32 %v3560_v53, %v1378_v37  ;;  %v2641_v48 = vpop.f32.mrb[2].mxu1 }
 0x169   : > { %v2554_v35 = vpop.f32.mrb[51].mxu0  ;;  %v2711_v50 = vadd.f32 %v3568_v2, %v2641_v48  ;;  %v1381_v17 = vpop.f32.mrb[3].mxu1  ;;  %v2704_v57 = vadd.f32 %v2703_v9, %v2534_v51 }
 0x16a   : > { %v2555_v55 = vadd.f32 %v2554_v35, %v2553_v41  ;;  %v2738_v18 = vadd.f32 %v2737_v45, %v2552_v38  ;;  %v2715_v22 = vadd.f32 %v3562_v54, %v1381_v17  ;;  %v2708_v58 = vadd.f32 %v2707_v47, %v3582_v32 }
 0x16b   : > { %v2712_v60 = vadd.f32 %v2711_v50, %v2537_v63 }
 0x16c   : > { %v3601_v61 = vadd.f32 %v2743_v31, %v2555_v55  ;;  %v2716_v14 = vadd.f32 %v2715_v22, %v3584_v44 }
 0x16e   : > { %v2556_v1 = vpop.f32.mrb[52].mxu0  ;;  %v2644_v40 = vpop.f32.mrb[4].mxu1 }
 0x16f   : > { %v2557_v53 = vpop.f32.mrb[53].mxu0  ;;  %v2719_v4 = vadd.f32 %v3578_v26, %v2644_v40  ;;  %v1394_v49 = vpop.f32.mrb[5].mxu1 }
 0x170   : > { %v2558_v2 = vadd.f32 %v2557_v53, %v2556_v1  ;;  %v2559_v42 = vpop.f32.mrb[54].mxu0  ;;  %v2723_v51 = vadd.f32 %v3572_v62, %v1394_v49  ;;  %v2645_v45 = vpop.f32.mrb[6].mxu1 }
 0x171   : > { %v2560_v6 = vpop.f32.mrb[55].mxu0  ;;  %v2727_v54 = vadd.f32 %v3580_v27, %v2645_v45  ;;  %v1397_v32 = vpop.f32.mrb[7].mxu1  ;;  %v3608_v59 = vadd.f32 %v2719_v4, %v2546_v3 }
 0x172   : > { %v2561_v63 = vadd.f32 %v2560_v6, %v2559_v42  ;;  %v2735_v31 = vadd.f32 %v3588_v56, %v2558_v2  ;;  %v2731_v44 = vadd.f32 %v3574_v13, %v1397_v32  ;;  %v3611_v39 = vadd.f32 %v2723_v51, %v2540_v5 }
 0x173   : > { %v3614_v7 = vadd.f32 %v2727_v54, %v2549_v24 }
 0x174   : > { %v2741_v26 = vadd.f32 %v3590_v11, %v2561_v63  ;;  %v3616_v8 = vadd.f32 %v2731_v44, %v2543_v10 }
 0x176   : > { %v2562_v62 = vpop.f32.mrb[56].mxu0 }
 0x177   : > { %v2563_v15 = vpop.f32.mrb[57].mxu0 }
 0x178   : > { %v2564_v27 = vadd.f32 %v2563_v15, %v2562_v62  ;;  %v2565_v46 = vpop.f32.mrb[58].mxu0 }
 0x179   : > { %v2566_v16 = vpop.f32.mrb[59].mxu0 }
 0x17a   : > { %v2567_v0 = vadd.f32 %v2566_v16, %v2565_v46  ;;  %v3619_v56 = vadd.f32 %v3593_v12, %v2564_v27 }
 0x17c   : > { %v3621_v19 = vadd.f32 %v2755_v43, %v2567_v0 }
 0x17e   : > { %v2568_v13 = vpop.f32.mrb[60].mxu0 }
 0x17f   : > { %v2569_v5 = vpop.f32.mrb[61].mxu0 }
 0x180   : > { %v2570_v3 = vadd.f32 %v2569_v5, %v2568_v13  ;;  %v2571_v11 = vpop.f32.mrb[62].mxu0 }
 0x181   : > { %v2572_v20 = vpop.f32.mrb[63].mxu0 }
 0x182   : > { %v2573_v10 = vadd.f32 %v2572_v20, %v2571_v11  ;;  %v2747_v52 = vadd.f32 %v2746_v28, %v2570_v3 }
 0x184   : > { %v3623_v21 = vadd.f32 %v2752_v29, %v2573_v10 }
 0x186   : > { %v2672_v23 = vpop.f32.mrb[64].mxu0  ;;  %v2680_v43 = vpop.f32.mrb[8].mxu1 }
 0x187   : > { %v2705_v12 = vadd.f32 %v2704_v57, %v2672_v23  ;;  %v1813_v24 = vpop.f32.mrb[65].mxu0  ;;  %v2736_v33 = vadd.f32 %v2735_v31, %v2680_v43  ;;  %v1845_v28 = vpop.f32.mrb[9].mxu1 }
 0x188   : > { %v2709_v34 = vadd.f32 %v2708_v58, %v1813_v24  ;;  %v2673_v29 = vpop.f32.mrb[66].mxu0  ;;  %v2739_v9 = vadd.f32 %v2738_v18, %v1845_v28  ;;  %v2681_v38 = vpop.f32.mrb[10].mxu1 }
 0x189   : > { %v1933_v36 = vmul.f32 %v2705_v12, %v3629_v30  ;;  %v2713_v37 = vadd.f32 %v2712_v60, %v2673_v29  ;;  %v1816_v41 = vpop.f32.mrb[67].mxu0  ;;  %v1941_v47 = vmul.f32 %v2736_v33, %v3629_v30  ;;  %v2742_v35 = vadd.f32 %v2741_v26, %v2681_v38  ;;  %v1848_v17 = vpop.f32.mrb[11].mxu1 }
 0x18a   : > { %v1931_v48 = vmul.f32 %v2709_v34, %v3629_v30  ;;  %v2717_v50 = vadd.f32 %v2716_v14, %v1816_v41  ;;  %v1939_v57 = vmul.f32 %v2739_v9, %v3629_v30  ;;  %v2745_v58 = vadd.f32 %v3601_v61, %v1848_v17 }
 0x18b   : > { %v1956_v55 = vadd.f32 %v3634_v25, %v1933_v36  ;;  %v1934_v22 = vmul.f32 %v2713_v37, %v3629_v30  ;;  %v1964_v18 = vadd.f32 %v3634_v25, %v1941_v47  ;;  %v1942_v1 = vmul.f32 %v2742_v35, %v3629_v30 }
 0x18c   : > { %v1954_v60 = vadd.f32 %v3634_v25, %v1931_v48  ;;  %v1932_v40 = vmul.f32 %v2717_v50, %v3629_v30  ;;  %v1962_v14 = vadd.f32 %v3634_v25, %v1939_v57  ;;  %v1940_v49 = vmul.f32 %v2745_v58, %v3629_v30 }
 0x18d   : > { %v1972_v53 = vmax.f32 %v1956_v55, 0.0  ;;  %v1957_v4 = vadd.f32 %v3634_v25, %v1934_v22  ;;  %v1980_v2 = vmax.f32 %v1964_v18, 0.0  ;;  %v1965_v61 = vadd.f32 %v3634_v25, %v1942_v1 }
 0x18e   : > { %v1970_v42 = vmax.f32 %v1954_v60, 0.0  ;;  %v1955_v51 = vadd.f32 %v3634_v25, %v1932_v40  ;;  %v2676_v45 = vpop.f32.mrb[68].mxu0  ;;  %v1978_v6 = vmax.f32 %v1962_v14, 0.0  ;;  %v1963_v32 = vadd.f32 %v3634_v25, %v1940_v49  ;;  %v2684_v31 = vpop.f32.mrb[12].mxu1 }
 0x18f   : > { %1988 = vst [vmem:[%s3654_s24 + $0x10] sm:$0xff] %v1972_v53  ;;  %v1973_v54 = vmax.f32 %v1957_v4, 0.0  ;;  %v2721_v63 = vadd.f32 %v3608_v59, %v2676_v45  ;;  %v1829_v44 = vpop.f32.mrb[69].mxu0  ;;  %1996 = vst [vmem:[%s3654_s24 + $0x50] sm:$0xff] %v1980_v2  ;;  %v1981_v26 = vmax.f32 %v1965_v61, 0.0  ;;  %v2748_v15 = vadd.f32 %v2747_v52, %v2684_v31  ;;  %v1861_v46 = vpop.f32.mrb[13].mxu1 }
 0x190   : > { %1986 = vst [vmem:[%s3654_s24] sm:$0xff] %v1970_v42  ;;  %v1971_v62 = vmax.f32 %v1955_v51, 0.0  ;;  %v2725_v27 = vadd.f32 %v3611_v39, %v1829_v44  ;;  %v2677_v16 = vpop.f32.mrb[70].mxu0  ;;  %1994 = vst [vmem:[%s3654_s24 + $0x40] sm:$0xff] %v1978_v6  ;;  %v1979_v0 = vmax.f32 %v1963_v32, 0.0  ;;  %v2751_v13 = vadd.f32 %v3619_v56, %v1861_v46  ;;  %v2685_v3 = vpop.f32.mrb[14].mxu1 }
 0x191   : > { %1989 = vst [vmem:[%s3654_s24 + $0x18] sm:$0xff] %v1973_v54  ;;  %v1937_v59 = vmul.f32 %v2721_v63, %v3629_v30  ;;  %v2729_v5 = vadd.f32 %v3614_v7, %v2677_v16  ;;  %v1832_v11 = vpop.f32.mrb[71].mxu0  ;;  %1997 = vst [vmem:[%s3654_s24 + $0x58] sm:$0xff] %v1981_v26  ;;  %v1945_v20 = vmul.f32 %v2748_v15, %v3629_v30  ;;  %v1864_v23 = vpop.f32.mrb[15].mxu1 }
 0x192   : > { %1987 = vst [vmem:[%s3654_s24 + $0x8] sm:$0xff] %v1971_v62  ;;  %v1935_v39 = vmul.f32 %v2725_v27, %v3629_v30  ;;  %v2754_v10 = vadd.f32 %v3623_v21, %v2685_v3  ;;  %v2733_v52 = vadd.f32 %v3616_v8, %v1832_v11  ;;  %1995 = vst [vmem:[%s3654_s24 + $0x48] sm:$0xff] %v1979_v0 }
 0x193   : > { %v1960_v7 = vadd.f32 %v3634_v25, %v1937_v59  ;;  %v1943_v56 = vmul.f32 %v2751_v13, %v3629_v30  ;;  %v1938_v12 = vmul.f32 %v2729_v5, %v3629_v30  ;;  %v2757_v43 = vadd.f32 %v3621_v19, %v1864_v23 }
 0x194   : > { %v1968_v24 = vadd.f32 %v3634_v25, %v1945_v20  ;;  %v1958_v21 = vadd.f32 %v3634_v25, %v1935_v39  ;;  %v1946_v8 = vmul.f32 %v2754_v10, %v3629_v30  ;;  %v1936_v33 = vmul.f32 %v2733_v52, %v3629_v30 }
 0x195   : > { %v1976_v34 = vmax.f32 %v1960_v7, 0.0  ;;  %v1966_v28 = vadd.f32 %v3634_v25, %v1943_v56  ;;  %v1961_v29 = vadd.f32 %v3634_v25, %v1938_v12  ;;  %v1944_v36 = vmul.f32 %v2757_v43, %v3629_v30 }
 0x196   : > { %v1984_v19 = vmax.f32 %v1968_v24, 0.0  ;;  %v1974_v9 = vmax.f32 %v1958_v21, 0.0  ;;  %v1969_v37 = vadd.f32 %v3634_v25, %v1946_v8  ;;  %v1959_v38 = vadd.f32 %v3634_v25, %v1936_v33 }
 0x197   : > { %1992 = vst [vmem:[%s3654_s24 + $0x30] sm:$0xff] %v1976_v34  ;;  %v1982_v41 = vmax.f32 %v1966_v28, 0.0  ;;  %v1977_v47 = vmax.f32 %v1961_v29, 0.0  ;;  %v1967_v48 = vadd.f32 %v3634_v25, %v1944_v36 }
 0x198   : > { %2000 = vst [vmem:[%s3654_s24 + $0x70] sm:$0xff] %v1984_v19  ;;  %1990 = vst [vmem:[%s3654_s24 + $0x20] sm:$0xff] %v1974_v9  ;;  %v1985_v30 = vmax.f32 %v1969_v37, 0.0  ;;  %v1975_v35 = vmax.f32 %v1959_v38, 0.0 }
 0x199   : > { %1998 = vst [vmem:[%s3654_s24 + $0x60] sm:$0xff] %v1982_v41  ;;  %1993 = vst [vmem:[%s3654_s24 + $0x38] sm:$0xff] %v1977_v47  ;;  %v1983_v50 = vmax.f32 %v1967_v48, 0.0 }
 0x19a   : > { %2001 = vst [vmem:[%s3654_s24 + $0x78] sm:$0xff] %v1985_v30  ;;  %1991 = vst [vmem:[%s3654_s24 + $0x28] sm:$0xff] %v1975_v35 }
 0x19b   : > { %1999 = vst [vmem:[%s3654_s24 + $0x68] sm:$0xff] %v1983_v50 }
 0x19c   : > { %2961 = shalt.err (!%p2958_p6)
}
 0x19d   : > { %s2962_s27 = scalar_lea.hbm %s3700_s10, 2048  ;;  %s2966_s8 = scalar_lea.hbm %s3767_s4, 8192 }
 0x19e   : > { %p2963_p7 = scmp.ne.s32.totalorder %s3700_s10, %s2962_s27  ;;  %p2967_p11 = scmp.lt.u32.totalorder %s3700_s10, %s3767_s4 }
 0x19f   : > { %p2968_p12 = scmp.lt.u32.totalorder %s2966_s8, %s2962_s27  ;;  %p2970_p0 = scmp.lt.u32.totalorder %s2962_s27, %s3700_s10 }
 0x1a0   : > { %p2964_p9 = pnand %p2963_p7, %p3123_p3 }
 0x1a1   : > { %p2969_p13 = por %p2968_p12, %p2967_p11 }
 0x1a2   : > { %p2965_p10 = pneg %p2964_p9 }
 0x1a3   : > { %p2971_p1 = por %p2970_p0, %p2969_p13 }
 0x1a5   : > { %p2972_p2 = pnand %p2971_p1, %p2965_p10 }
 0x1a7   : > { %2975 = shalt.err (!%p2972_p2)
}
 0x1a8   : > { %s3045_s9 = smov 128   ;;  %s3046_s6 = smov 8  }
 0x1a9   : > { %2783 = dma.vmem_to_hbm [thread:$0]  (%p3123_p3), %s3702_s30, 2048, %s3700_s10, %s3711_s11, %s3045_s9, %s3045_s9, %s3046_s6  }
 0x1aa PF: > { %p2789_p4 = scmp.ge.s32.totalorder %s3042_s22, 2  ;;  %s2035_s13 = sand.u32 1, %s3014_s15  }
 0x1ab   : > { %s2036_s14 = scalar_lea.sflag [#allocation5], %s2035_s13 }
 0x1ac   : > { %p2786_p5 = pnand %p2789_p4, %p3132_p8 }
 0x1ae   : > { %3009 = dma.done.wait (!%p2786_p5), %s2036_s14, 2048  }
 0x1af   : > { %3011 = vsyncadd (!%p2786_p5), %s2036_s14, 4294965248  ;;  %s17_s22 = sadd.s32 1, %s3042_s22   ;;  %s3770_s15 = smov %s3018_s16 }
 0x1b0   : > { %p14_p6 = scmp.ge.s32.totalorder %s17_s22, 6   ;;  %s3771_s16 = smov %s3022_s17 }
 0x1b1   : > { %s3772_s17 = smov %s3141_s7  ;;  %s3773_s18 = smov %s3034_s20 }
 0x1b2   : > { %s3774_s19 = smov %s3038_s21  ;;  %s3775_s20 = smov %s3778_s25 }
 0x1b3   : > { %s3776_s21 = smov %s3782_s26  ;;  %16 = sbr.rel (!%p14_p6) target bundleno = 5 (0x5), region = 86 }
 0x1ba   :  { %2041 = vsyncpa [#allocation5], 1 }
 0x1bb   :  { %2043 = vsyncpa [#allocation5 + $0x1], 1 }

</bundles_post_ra>
